<compile_context>
chip_gen: v7x
topology: tpu7x:2x2x1
jax: 0.10.0
libtpu: 0.0.40
codegen_flags: <defaults>
</compile_context>

<pallas_src>
import functools
import math

import jax
import jax.numpy as jnp
from jax.experimental import pallas as pl
from jax.experimental.pallas import tpu as pltpu

BN_EPS = 1e-5
TM_CAP = 512          # cap on the M tile (keeps weight matrices single-streamed here)
TK_CAP = 1024         # cap on the K tile


def _round_up(x, m):
    return ((x + m - 1) // m) * m


def _pad2(x, r, c):
    pr, pc = r - x.shape[0], c - x.shape[1]
    if pr == 0 and pc == 0:
        return x
    return jnp.pad(x, ((0, pr), (0, pc)))


@functools.lru_cache(maxsize=None)
def _lane_tile():
    """256-wide N tiles on v6e/v7x (2x256x256 MXU), 128 on v5e and older (128-wide MXU)."""
    try:
        kind = jax.devices()[0].device_kind.lower()
    except Exception:
        return 128
    if ("v6" in kind) or ("v7" in kind) or ("tpu7" in kind):
        return 256
    return 128


def _choose_k_tiles(K):
    """Pad K to the next multiple of 128 and pick the largest tk<=TK_CAP dividing it exactly."""
    Kp = _round_up(K, 128)
    tk, cand = 128, 128
    while cand <= min(TK_CAP, Kp):
        if Kp % cand == 0:
            tk = cand
        cand += 128
    return Kp, tk


# ----------------------------- Pallas kernels ------------------------------------------


def _gemm_kernel(a_ref, b_ref, c_ref, o_ref, acc_ref, *, relu):
    """out = act(A@B + bias).  bf16 operands, f32 accumulation."""
    k = pl.program_id(2)

    @pl.when(k == 0)
    def _():
        acc_ref[...] = jnp.zeros_like(acc_ref)

    acc_ref[...] += jnp.dot(a_ref[...], b_ref[...], preferred_element_type=jnp.float32)

    @pl.when(k == pl.num_programs(2) - 1)
    def _():
        y = acc_ref[...] + c_ref[...]
        if relu:
            y = jnp.maximum(y, 0.0)
        o_ref[...] = y.astype(o_ref.dtype)


def _gemm_kernel_res(a_ref, b_ref, c_ref, r_ref, o_ref, acc_ref, *, relu):
    """out = act(A@B + bias + residual)."""
    k = pl.program_id(2)

    @pl.when(k == 0)
    def _():
        acc_ref[...] = jnp.zeros_like(acc_ref)

    acc_ref[...] += jnp.dot(a_ref[...], b_ref[...], preferred_element_type=jnp.float32)

    @pl.when(k == pl.num_programs(2) - 1)
    def _():
        y = acc_ref[...] + c_ref[...] + r_ref[...].astype(jnp.float32)
        if relu:
            y = jnp.maximum(y, 0.0)
        o_ref[...] = y.astype(o_ref.dtype)


@functools.lru_cache(maxsize=None)
def _build_gemm(Mp, Kp, Np, tm, tn, tk, relu, has_res):
    grid = (Mp // tm, Np // tn, Kp // tk)
    in_specs = [
        pl.BlockSpec((tm, tk), lambda i, j, k: (i, k)),    # A (bf16 activations)
        pl.BlockSpec((tk, tn), lambda i, j, k: (k, j)),    # B (bf16 weights, pre-padded)
        pl.BlockSpec((1, tn), lambda i, j, k: (0, j)),     # per-channel bias (f32)
    ]
    if has_res:
        in_specs.append(pl.BlockSpec((tm, tn), lambda i, j, k: (i, j)))   # residual (bf16)
        kernel = functools.partial(_gemm_kernel_res, relu=relu)
    else:
        kernel = functools.partial(_gemm_kernel, relu=relu)
    fn = pl.pallas_call(
        kernel,
        out_shape=jax.ShapeDtypeStruct((Mp, Np), jnp.bfloat16),
        grid_spec=pltpu.PrefetchScalarGridSpec(
            num_scalar_prefetch=0,
            grid=grid,
            in_specs=in_specs,
            out_specs=pl.BlockSpec((tm, tn), lambda i, j, k: (i, j)),
            scratch_shapes=[pltpu.VMEM((tm, tn), jnp.float32)],
        ),
        compiler_params=pltpu.CompilerParams(
            dimension_semantics=("parallel", "parallel", "arbitrary")),
    )
    return jax.jit(fn)


def _maxpool_kernel(x_ref, o_ref):
    # x_ref: (9, tm, Cp) -> max over the 9 window taps
    o_ref[...] = jnp.max(x_ref[...], axis=0)


@functools.lru_cache(maxsize=None)
def _build_maxpool(Mp, Cp, tm, dtype_name):
    dtype = jnp.dtype(dtype_name)
    fn = pl.pallas_call(
        _maxpool_kernel,
        out_shape=jax.ShapeDtypeStruct((Mp, Cp), dtype),
        grid_spec=pltpu.PrefetchScalarGridSpec(
            num_scalar_prefetch=0,
            grid=(Mp // tm,),
            in_specs=[pl.BlockSpec((9, tm, Cp), lambda i: (0, i, 0))],
            out_specs=pl.BlockSpec((tm, Cp), lambda i: (i, 0)),
        ),
        compiler_params=pltpu.CompilerParams(dimension_semantics=("parallel",)),
    )
    return jax.jit(fn)


def maxpool_3x3_s2_p1(x):
    """PyTorch nn.MaxPool2d(3, stride=2, padding=1) on NHWC input (tiled Pallas reduction)."""
    n, h, w, c = x.shape
    xp = jnp.pad(x, ((0, 0), (1, 1), (1, 1), (0, 0)), constant_values=-jnp.inf)
    oh = (h - 1) // 2 + 1
    ow = (w - 1) // 2 + 1
    wins = [xp[:, dy:dy + 2 * oh:2, dx:dx + 2 * ow:2, :]
            for dy in range(3) for dx in range(3)]
    m = n * oh * ow
    st = jnp.stack(wins, axis=0).reshape(9, m, c)
    tm = TM_CAP if m >= TM_CAP else _round_up(m, 8)
    mp, cp = _round_up(m, tm), _round_up(c, 128)
    st = jnp.pad(st, ((0, 0), (0, mp - m), (0, cp - c)))
    out = _build_maxpool(mp, cp, tm, str(st.dtype))(st)
    return out[:m, :c].reshape(n, oh, ow, c)


# ----------------------------- conv wrapper (im2col glue + Pallas GEMM) -----------------


def conv2d_pallas(x, prep, stride=1, pad=0, relu=True, residual=None):
    """x: (N,H,W,Cin) bf16, prep: prepared conv dict.  Returns (N,OH,OW,Cout) bf16."""
    n, h, wd, cin = x.shape
    kh, kw = prep['kh'], prep['kw']
    oh = (h + 2 * pad - kh) // stride + 1
    ow = (wd + 2 * pad - kw) // stride + 1

    if kh == 1 and kw == 1 and pad == 0:
        A = x[:, ::stride, ::stride, :].reshape(n * oh * ow, cin)
    else:
        # TODO(synk): fold the kh*kw taps into extra K grid steps (index_map over the NHWC
        # activation) so the 9x-expanded im2col matrix never hits HBM.
        xp = jnp.pad(x, ((0, 0), (pad, pad), (pad, pad), (0, 0)))
        cols = [xp[:, dy:dy + stride * oh:stride, dx:dx + stride * ow:stride, :]
                for dy in range(kh) for dx in range(kw)]
        A = jnp.stack(cols, axis=3).reshape(n * oh * ow, kh * kw * cin)

    M = n * oh * ow
    K, N = prep['K'], prep['N']
    Kp, Np, tk, tn = prep['Kp'], prep['Np'], prep['tk'], prep['tn']
    tm = TM_CAP if M >= TM_CAP else _round_up(M, 8)
    Mp = _round_up(M, tm)

    Ap = _pad2(A.astype(jnp.bfloat16), Mp, Kp)
    args = [Ap, prep['B'], prep['bias']]
    has_res = residual is not None
    if has_res:
        Rp = _pad2(residual.reshape(M, N).astype(jnp.bfloat16), Mp, Np)
        args.append(Rp)

    out = _build_gemm(Mp, Kp, Np, tm, tn, tk, bool(relu), has_res)(*args)
    return out[:M, :N].reshape(n, oh, ow, N)


# ----------------------------- parameter construction -----------------------------------


def _he(key, kh, kw, cin, cout):
    std = math.sqrt(2.0 / (kh * kw * cin))
    return jax.random.normal(key, (kh, kw, cin, cout), jnp.float32) * std


def prep_conv(w, bias=None, bn=True):
    """Fold frozen-BN into the weights, pre-pad and pre-cast to bf16 (done once, off the fwd path)."""
    kh, kw, cin, cout = w.shape
    if bn:
        # FrozenBatchNorm2d defaults: gamma=1, beta=0, mean=0, var=1 -> scale=1/sqrt(1+eps), bias=0
        w = w * (1.0 / math.sqrt(1.0 + BN_EPS))
        b = jnp.zeros((cout,), jnp.float32)
    else:
        b = bias if bias is not None else jnp.zeros((cout,), jnp.float32)
    K, N = kh * kw * cin, cout
    Kp, tk = _choose_k_tiles(K)
    lane = _lane_tile()
    tn = lane if N >= lane else 128
    Np = _round_up(N, tn)
    B = _pad2(w.reshape(K, N), Kp, Np).astype(jnp.bfloat16)
    bp = _pad2(b.reshape(1, N), 1, Np).astype(jnp.float32)
    return {'B': B, 'bias': bp, 'kh': kh, 'kw': kw,
            'K': K, 'N': N, 'Kp': Kp, 'Np': Np, 'tk': tk, 'tn': tn}


def make_backbone_params(key):
    keys = iter(list(jax.random.split(key, 64)))
    params = {'conv1': prep_conv(_he(next(keys), 7, 7, 3, 64))}
    layers = []
    cin = 64
    for width, nblocks in [(64, 3), (128, 4), (256, 6), (512, 3)]:
        blocks = []
        for b in range(nblocks):
            blk = {
                'conv1': prep_conv(_he(next(keys), 1, 1, cin, width)),
                'conv2': prep_conv(_he(next(keys), 3, 3, width, width)),
                'conv3': prep_conv(_he(next(keys), 1, 1, width, width * 4)),
            }
            if b == 0:
                blk['down'] = prep_conv(_he(next(keys), 1, 1, cin, width * 4))
            blocks.append(blk)
            cin = width * 4
        layers.append(blocks)
    params['layers'] = layers
    return params


def make_depred_params(key):
    ks = jax.random.split(key, 6)

    def conv(kw_, kb_, cin, cout):
        return prep_conv(_he(kw_, 3, 3, cin, cout),
                         bias=jax.random.normal(kb_, (cout,), jnp.float32) * 0.01,
                         bn=False)

    return {
        'de_pred4': conv(ks[0], ks[1], 2048, 2048),
        'de_pred3': conv(ks[2], ks[3], 2048 + 1024, 1024),
        'de_pred2': conv(ks[4], ks[5], 1024 + 512, 512),
    }


# ----------------------------- ResNet50 + decoder forward -------------------------------


def bottleneck_forward(x, blk, stride):
    out = conv2d_pallas(x, blk['conv1'], stride=1, pad=0, relu=True)
    out = conv2d_pallas(out, blk['conv2'], stride=stride, pad=1, relu=True)
    if 'down' in blk:
        identity = conv2d_pallas(x, blk['down'], stride=stride, pad=0, relu=False)
    else:
        identity = x
    # relu(bn3(conv3(out)) + identity) fused into the GEMM epilogue
    out = conv2d_pallas(out, blk['conv3'], stride=1, pad=0, relu=True, residual=identity)
    return out


def interp_nearest(x, size):
    n, h, w, c = x.shape
    oh, ow = size
    hi = (jnp.arange(oh) * h) // oh
    wi = (jnp.arange(ow) * w) // ow
    return x[:, hi][:, :, wi]


def interp_bilinear_align(x, size):
    n, h, w, c = x.shape
    oh, ow = size

    def coords(o, i):
        if o == 1 or i == 1:
            return jnp.zeros((o,), jnp.float32)
        return jnp.arange(o, dtype=jnp.float32) * (i - 1) / (o - 1)

    sh, sw = coords(oh, h), coords(ow, w)
    h0 = jnp.floor(sh).astype(jnp.int32)
    w0 = jnp.floor(sw).astype(jnp.int32)
    h1 = jnp.minimum(h0 + 1, h - 1)
    w1 = jnp.minimum(w0 + 1, w - 1)
    fh = (sh - h0)[None, :, None, None]
    fw = (sw - w0)[None, None, :, None]

    def g(hi, wi):
        return x[:, hi][:, :, wi].astype(jnp.float32)

    top = g(h0, w0) * (1.0 - fw) + g(h0, w1) * fw
    bot = g(h1, w0) * (1.0 - fw) + g(h1, w1) * fw
    return top * (1.0 - fh) + bot * fh


def backbone_forward(x_nhwc, bb, dp, reduction):
    h_in, w_in = x_nhwc.shape[1], x_nhwc.shape[2]
    size = (h_in // reduction, w_in // reduction)

    # stem: conv1 7x7/2 + frozen BN + relu, then 3x3/2 maxpool
    x = conv2d_pallas(x_nhwc, bb['conv1'], stride=2, pad=3, relu=True)
    x = maxpool_3x3_s2_p1(x)

    feats = []
    strides = [1, 2, 2, 2]       # dilation=False -> layer4 keeps stride 2
    for li, blocks in enumerate(bb['layers']):
        for bi, blk in enumerate(blocks):
            x = bottleneck_forward(x, blk, strides[li] if bi == 0 else 1)
        feats.append(x)
    _, layer2, layer3, layer4 = feats

    # decoder
    x = conv2d_pallas(layer4, dp['de_pred4'], stride=1, pad=1, relu=True)
    x4_out = x
    x = interp_nearest(x, layer3.shape[1:3])             # F.interpolate default = nearest
    # TODO(synk): fuse the concat into the GEMM K-reduction (two A sources into one acc_ref).
    x = jnp.concatenate([layer3, x], axis=-1)
    x = conv2d_pallas(x, dp['de_pred3'], stride=1, pad=1, relu=True)
    x3_out = x
    x = interp_nearest(x, layer2.shape[1:3])
    x = jnp.concatenate([layer2, x], axis=-1)
    x = conv2d_pallas(x, dp['de_pred2'], stride=1, pad=1, relu=True)
    x2_out = x

    outs = [interp_bilinear_align(f, size) for f in (x2_out, x3_out, x4_out)]
    return jnp.concatenate(outs, axis=-1)                # (N, H/r, W/r, 3584) f32


# ----------------------------- main ------------------------------------------------------

if __name__ == "__main__":
    key = jax.random.PRNGKey(0)
    k_in, k_bb, k_dp = jax.random.split(key, 3)

    # small but architecture-consistent input: NCHW (2, 3, 64, 64), reduction=8
    x_nchw = jax.random.normal(k_in, (2, 3, 64, 64), jnp.float32)
    bb_params = make_backbone_params(k_bb)
    dp_params = make_depred_params(k_dp)

    x_nhwc = jnp.transpose(x_nchw, (0, 2, 3, 1)).astype(jnp.bfloat16)
    out_nhwc = backbone_forward(x_nhwc, bb_params, dp_params, reduction=8)
    out_nchw = jnp.transpose(out_nhwc, (0, 3, 1, 2)).astype(jnp.float32)

    out_nchw = jax.block_until_ready(out_nchw)
    assert out_nchw.shape == (2, 3584, 8, 8), out_nchw.shape
    assert bool(jnp.all(jnp.isfinite(out_nchw)))
    print("KERNEL_OK")
</pallas_src>

<mosaic_0001>
module attributes {stable_mosaic.version = 11 : i64} {
  func.func @_gemm_kernel(%arg0: i32, %arg1: i32, %arg2: i32, %arg3: memref<512x256xbf16, #tpu.memory_space<vmem>>, %arg4: memref<256x128xbf16, #tpu.memory_space<vmem>>, %arg5: memref<1x128xf32, #tpu.memory_space<vmem>>, %arg6: memref<512x128xbf16, #tpu.memory_space<vmem>>, %arg7: memref<512x128xf32, #tpu.memory_space<vmem>>) attributes {dimension_semantics = [#tpu.dimension_semantics<parallel>, #tpu.dimension_semantics<parallel>, #tpu.dimension_semantics<arbitrary>], iteration_bounds = array<i64: 4, 1, 1>, scalar_prefetch = 0 : i64, scratch_operands = 1 : i64, tpu.core_type = #tpu.core_type<tc>, window_params = [{transform_indices = @transform_0, window_bounds = array<i64: 512, 256>}, {transform_indices = @transform_1, window_bounds = array<i64: 256, 128>}, {transform_indices = @transform_2, window_bounds = array<i64: 1, 128>}, {transform_indices = @transform_3, window_bounds = array<i64: 512, 128>}]} {
    %c0_i32 = arith.constant 0 : i32
    %0 = arith.cmpi eq, %arg2, %c0_i32 : i32
    %1 = arith.extui %0 : i1 to i32
    %c0_i32_0 = arith.constant 0 : i32
    %2 = arith.cmpi ne, %1, %c0_i32_0 : i32
    scf.if %2 {
      %cst_10 = arith.constant 0.000000e+00 : f32
      %12 = vector.broadcast %cst_10 : f32 to vector<512x128xf32>
      %c0_11 = arith.constant 0 : index
      %c0_12 = arith.constant 0 : index
      %13 = vector.load %arg7[%c0_11, %c0_12] : memref<512x128xf32, #tpu.memory_space<vmem>>, vector<512x128xf32>
      tpu.vector_store %arg7[%c0_11, %c0_12], %12 {strides = array<i32>} : memref<512x128xf32, #tpu.memory_space<vmem>>, vector<512x128xf32>,
    } else {
    }
    %c0 = arith.constant 0 : index
    %c0_1 = arith.constant 0 : index
    %3 = vector.load %arg7[%c0, %c0_1] : memref<512x128xf32, #tpu.memory_space<vmem>>, vector<512x128xf32>
    %c0_2 = arith.constant 0 : index
    %c0_3 = arith.constant 0 : index
    %4 = vector.load %arg3[%c0_2, %c0_3] : memref<512x256xbf16, #tpu.memory_space<vmem>>, vector<512x256xbf16>
    %c0_4 = arith.constant 0 : index
    %c0_5 = arith.constant 0 : index
    %5 = vector.load %arg4[%c0_4, %c0_5] : memref<256x128xbf16, #tpu.memory_space<vmem>>, vector<256x128xbf16>
    %cst = arith.constant dense<0.000000e+00> : vector<512x128xf32>
    %6 = tpu.matmul %4, %5, %cst {dimension_numbers = #tpu.dot_dimension_numbers<[1], [0], [0], [1], [0, 0, 1, 1], [], []>} : vector<512x256xbf16>, vector<256x128xbf16>, vector<512x128xf32> -> vector<512x128xf32>
    %7 = arith.addf %3, %6 : vector<512x128xf32>
    %c0_6 = arith.constant 0 : index
    %c0_7 = arith.constant 0 : index
    %8 = vector.load %arg7[%c0_6, %c0_7] : memref<512x128xf32, #tpu.memory_space<vmem>>, vector<512x128xf32>
    tpu.vector_store %arg7[%c0_6, %c0_7], %7 {strides = array<i32>} : memref<512x128xf32, #tpu.memory_space<vmem>>, vector<512x128xf32>,
    %c0_i32_8 = arith.constant 0 : i32
    %9 = arith.cmpi eq, %arg2, %c0_i32_8 : i32
    %10 = arith.extui %9 : i1 to i32
    %c0_i32_9 = arith.constant 0 : i32
    %11 = arith.cmpi ne, %10, %c0_i32_9 : i32
    scf.if %11 {
      %c0_10 = arith.constant 0 : index
      %c0_11 = arith.constant 0 : index
      %12 = vector.load %arg7[%c0_10, %c0_11] : memref<512x128xf32, #tpu.memory_space<vmem>>, vector<512x128xf32>
      %c0_12 = arith.constant 0 : index
      %c0_13 = arith.constant 0 : index
      %13 = vector.load %arg5[%c0_12, %c0_13] : memref<1x128xf32, #tpu.memory_space<vmem>>, vector<1x128xf32>
      %14 = vector.broadcast %13 : vector<1x128xf32> to vector<512x128xf32>
      %15 = arith.addf %12, %14 : vector<512x128xf32>
      %cst_14 = arith.constant 0.000000e+00 : f32
      %16 = vector.broadcast %cst_14 : f32 to vector<512x128xf32>
      %17 = arith.maximumf %15, %16 : vector<512x128xf32>
      %18 = arith.truncf %17 : vector<512x128xf32> to vector<512x128xbf16>
      %c0_15 = arith.constant 0 : index
      %c0_16 = arith.constant 0 : index
      %19 = vector.load %arg6[%c0_15, %c0_16] : memref<512x128xbf16, #tpu.memory_space<vmem>>, vector<512x128xbf16>
      tpu.vector_store %arg6[%c0_15, %c0_16], %18 {strides = array<i32>} : memref<512x128xbf16, #tpu.memory_space<vmem>>, vector<512x128xbf16>,
    } else {
    }
    return
  }
  func.func @transform_0(%arg0: i32, %arg1: i32, %arg2: i32) -> (i32, i32) {
    %c0_i32 = arith.constant 0 : i32
    return %arg0, %arg2 : i32, i32
  }
  func.func @transform_1(%arg0: i32, %arg1: i32, %arg2: i32) -> (i32, i32) {
    %c0_i32 = arith.constant 0 : i32
    return %arg2, %arg1 : i32, i32
  }
  func.func @transform_2(%arg0: i32, %arg1: i32, %arg2: i32) -> (i32, i32) {
    %c0_i32 = arith.constant 0 : i32
    %c0_i32_0 = arith.constant 0 : i32
    return %c0_i32, %arg1 : i32, i32
  }
  func.func @transform_3(%arg0: i32, %arg1: i32, %arg2: i32) -> (i32, i32) {
    %c0_i32 = arith.constant 0 : i32
    return %arg0, %arg1 : i32, i32
  }
}

</mosaic_0001>

<bundles_post_ra>
// kernel: tpu_custom_call.1
= control target key start
LH: loop header
LB: loop body
LE: loop exit
PB: predicated region body
PF: predicated region fallthrough
CT: control target
= control target key end

     0   :  { %8 = vsyncpa [#allocation4], 0  ;;  %s3215_s0 = inlined_call_operand.hbm [shape: bf16[2048,256], index: 0, kind: input, shape index: {}]   ;;  %s3216_s1 = inlined_call_operand.hbm [shape: bf16[256,128], index: 1, kind: input, shape index: {}]   ;;  %s3217_s2 = inlined_call_operand.vmem [shape: f32[1,128], index: 2, kind: input, shape index: {}]   ;;  %s3218_s3 = inlined_call_operand.hbm [shape: bf16[2048,128], index: 3, kind: output, shape index: {}]  }
   0x1   :  { %10 = vsyncpa [#allocation4 + $0x1], 0 }
   0x2   :  { %11 = vsyncpa [#allocation7], 0 }
   0x3   :  { %12 = vsyncpa [#allocation5], 0 }
   0x4   :  { %14 = vsyncpa [#allocation5 + $0x1], 0  ;;  %s2795_s12 = smov 0   ;;  %s2797_s13 = smov 0  }
   0x5   :  { %s2799_s14 = smov 0   ;;  %s2801_s15 = smov 0  }
   0x6   :  { %s2803_s16 = smov 0   ;;  %s2805_s17 = smov 0  }
   0x7 LB: > { %s1973_s18 = sadd.s32 4294967295, %s2763_s17   ;;  %s1974_s19 = sadd.s32 4294967294, %s2763_s17   ;;  %s2763_s17 = sphi %s2805_s17, %s20_s17   ;;  %s2759_s16 = sphi %s2803_s16, %s3241_s16   ;;  %s2755_s15 = sphi %s2801_s15, %s3240_s15   ;;  %s2751_s14 = sphi %s2799_s14, %s3239_s14   ;;  %s2747_s13 = sphi %s2797_s13, %s3238_s13   ;;  %s2743_s12 = sphi %s2795_s12, %s3237_s12  }
   0x8   : > { %p61_p0 = scmp.ne.s32.totalorder %s2747_s13, %s2743_s12  ;;  %p2829_p1 = scmp.eq.s32.totalorder %s1973_s18, 0 }
   0x9   : > { %p2833_p2 = scmp.eq.s32.totalorder %s1973_s18, 3  ;;  %p147_p3 = scmp.eq.s32.totalorder %s1974_s19, 3 }
   0xa   : > { %s3223_s20 = scalar_select %p2829_p1, 1, 0 }
   0xb   : > { %s3224_s21 = scalar_select %p2833_p2, 1, 0 }
   0xc   : > { %p2839_p4 = por %p2829_p1, %p61_p0  ;;  %p1975_p5 = scmp.ge.s32.totalorder %s2763_s17, 1 }
   0xd   : > { %p2844_p6 = por %p147_p3, %p61_p0  ;;  %p154_p7 = scmp.lt.s32.totalorder %s2763_s17, 5 }
   0xe   : > { %s3225_s22 = scalar_select %p2839_p4, 1, 0 }
   0xf   : > { %s3226_s23 = scalar_select %p2844_p6, 1, 0 }
  0x10   : > { %p2849_p8 = pnand %p1975_p5, %p154_p7  ;;  %s2765_s25 = smov [#allocation6]  }
  0x11   : > { %s170_s26 = sshll.u32 %s2765_s25, 4  ;;  %s39_s28 = sadd.s32 1, %s2759_s16  ;;  %s171_s26 = int_to_ptr.vmem [resolvable:$true] %s170_s26 }
  0x12   : > { %s3227_s24 = scalar_select %p2849_p8, 1, 0 }
  0x13   : > { %p2435_p9 = pneg %p2849_p8  ;;  %s2619_s4 = scalar_lea.hbm %s3216_s1, 2048 }
  0x14   : > { %p2620_p11 = scmp.ne.s32.totalorder %s3216_s1, %s2619_s4  ;;  %p2626_p3 = scmp.lt.u32.totalorder %s2619_s4, %s3216_s1 }
  0x15   : > { %p2857_p10 = pnand %p2435_p9, %p2829_p1 }
  0x17   : > { %p2621_p12 = pneg %p2857_p10 }
  0x19   : > { %p2622_p13 = pnand %p2621_p12, %p2620_p11 }
  0x1b   : > { %p2623_p0 = pneg %p2622_p13 }
  0x1d   : > { %p2628_p5 = pnand %p2626_p3, %p2623_p0 }
  0x1f   : > { %2631 = shalt.err (!%p2628_p5)
}
  0x20   : > { %s2632_s9 = scalar_lea.vmem %s171_s26, 2048  ;;  %p2640_p1 = scmp.lt.s32.totalorder %s171_s26, %s171_s26 }
  0x21   : > { %p2633_p7 = scmp.ne.s32.totalorder %s171_s26, %s2632_s9  ;;  %p2641_p4 = scmp.lt.s32.totalorder %s2632_s9, %s2632_s9 }
  0x23   : > { %p2635_p9 = pnand %p2633_p7, %p2621_p12  ;;  %p2642_p8 = por %p2641_p4, %p2640_p1 }
  0x25   : > { %p2636_p6 = pneg %p2635_p9 }
  0x27   : > { %p2643_p2 = pnand %p2642_p8, %p2636_p6 }
  0x29   : > { %2646 = shalt.err (!%p2643_p2)
}
  0x2a   : > { %s2766_s10 = smov 64   ;;  %s2767_s11 = smov 4  }
  0x2b   : > { %2438 = dma.hbm_to_vmem [thread:$0]  (!%p2857_p10), %s3216_s1, 2048, %s171_s26, [#allocation7], %s2766_s10, %s2766_s10, %s2767_s11  }
  0x2c   : > { %p41_p1 = scmp.ge.s32.totalorder %s39_s28, 4  ;;  %s48_s25 = sadd.s32 1, %s2751_s14 }
  0x2d   : > { %p55_p2 = scmp.ne.s32.totalorder %s2751_s14, %s2747_s13  ;;  %p56_p4 = scmp.eq.s32.totalorder %s2763_s17, 0 }
  0x2e   : > { %s3243_s28 = smov (%p41_p1, %s39_s28), 0  ;;  %p3230_p8 = scmp.ne.s32.totalorder %s3224_s21, 0 }
  0x2f   : > { %p2884_p6 = por %p56_p4, %p55_p2  ;;  %s43_s27 = ssub.s32 %s2759_s16, %s3243_s28 }
  0x30   : > { %p2890_p11 = por %p3230_p8, %p55_p2  ;;  %p2448_p12 = scmp.lt.s32.totalorder %s2763_s17, 4 }
  0x31   : > { %p46_p10 = scmp.eq.s32.totalorder %s43_s27, 0  ;;  %s190_s26 = sand.u32 1, %s2751_s14  }
  0x32   : > { %s1979_s4 = sshll.u32 %s190_s26, 9  ;;  %s2138_s6 = sshll.u32 %s2759_s16, 13 }
  0x33   : > { %s2899_s5 = scalar_select %p46_p10, %s2751_s14, %s48_s25  }
  0x34   : > { %s2905_s9 = scalar_lea.hbm %s3215_s0, %s2138_s6  ;;  %s194_s21 = scalar_lea.vmem [#allocation3], %s1979_s4 }
  0x35   : > { %s204_s10 = sshll.u32 %s194_s21, 4  ;;  %p2911_p13 = pnand %p2448_p12, %p2884_p6  ;;  %s2907_s10 = int_to_ptr.vmem [resolvable:$true] %s204_s10 }
  0x36   : > { %s2915_s18 = scalar_lea.sflag [#allocation4], %s190_s26  ;;  %s2647_s19 = scalar_lea.hbm %s2905_s9, 8192 }
  0x37   : > { %p2648_p0 = scmp.ne.s32.totalorder %s2905_s9, %s2647_s19  ;;  %p2649_p3 = pneg %p2911_p13 }
  0x38   : > { %s2652_s29 = scalar_lea.hbm %s3215_s0, 32768  ;;  %p2653_p9 = scmp.lt.u32.totalorder %s2905_s9, %s3215_s0 }
  0x39   : > { %p2650_p5 = pnand %p2649_p3, %p2648_p0  ;;  %p2654_p1 = scmp.lt.u32.totalorder %s2652_s29, %s2647_s19 }
  0x3a   : > { %p2656_p4 = scmp.lt.u32.totalorder %s2647_s19, %s2905_s9 }
  0x3b   : > { %p2651_p7 = pneg %p2650_p5  ;;  %p2655_p2 = por %p2654_p1, %p2653_p9 }
  0x3d   : > { %p2657_p6 = por %p2656_p4, %p2655_p2 }
  0x3f   : > { %p2658_p8 = pnand %p2657_p6, %p2651_p7 }
  0x41   : > { %2661 = shalt.err (!%p2658_p8)
}
  0x42   : > { %s2662_s26 = scalar_lea.vmem %s2907_s10, 8192  ;;  %s2768_s7 = smov [#allocation3]  }
  0x43   : > { %p2663_p12 = scmp.ne.s32.totalorder %s2907_s10, %s2662_s26  ;;  %s2667_s8 = sshll.u32 %s2768_s7, 4  ;;  %s2668_s8 = int_to_ptr.vmem [resolvable:$false] %s2667_s8 }
  0x44   : > { %s2669_s21 = scalar_lea.vmem %s2668_s8, 16384  ;;  %p2670_p5 = scmp.lt.s32.totalorder %s2907_s10, %s2668_s8 }
  0x45   : > { %p2665_p10 = pnand %p2663_p12, %p2649_p3  ;;  %p2671_p9 = scmp.lt.s32.totalorder %s2669_s21, %s2662_s26 }
  0x47   : > { %p2666_p0 = pneg %p2665_p10  ;;  %p2672_p1 = por %p2671_p9, %p2670_p5 }
  0x49   : > { %p2673_p2 = pnand %p2672_p1, %p2666_p0 }
  0x4b   : > { %2676 = shalt.err (!%p2673_p2)
}
  0x4c   : > { %s2769_s19 = smov 128   ;;  %s2770_s25 = smov 8  }
  0x4d   : > { %2442 = dma.hbm_to_vmem [thread:$0]  (!%p2911_p13), %s2905_s9, 8192, %s2907_s10, %s2915_s18, %s2769_s19, %s2769_s19, %s2770_s25  }
  0x4e   : > { %p3233_p3 = scmp.ne.s32.totalorder %s3227_s24, 0 }
  0x4f   : > { %s2946_s27 = sand.u32 (!%p3233_p3), 1, %s2747_s13   ;;  %p3234_p7 = scmp.ne.s32.totalorder (!%p3233_p3), %s3225_s22, 0 }
  0x50   : > { %216 = sbr.rel (%p3233_p3) target bundleno = 511 (0x1ff), region = 32  ;;  %s1984_s29 = sshll.u32 (!%p3233_p3), %s2946_s27, 9 }
  0x51   : > { %s219_s4 = scalar_lea.sflag (!%p3233_p3), [#allocation4], %s2946_s27  ;;  %s2950_s6 = scalar_lea.vmem (!%p3233_p3), [#allocation3], %s1984_s29 }
  0x57   : > { %2730 = dma.done.wait (%p3234_p7), %s219_s4, 8192  }
  0x58   : > { %2732 = vsyncadd (%p3234_p7), %s219_s4, 4294959104  ;;  %p3235_p13 = scmp.ne.s32.totalorder %s3223_s20, 0 }
  0x5a   : > { %2734 = dma.done.wait (%p3235_p13), [#allocation7], 2048  }
  0x5b   : > { %2736 = vsyncadd (%p3235_p13), [#allocation7], 4294965248  ;;  %v2771_v0 = vmov 0   ;;  %v2507_v1 = vld [vmem:[#allocation6] sm:$0xff]   ;;  %v2508_v2 = vld [vmem:[#allocation6 + $0x8] sm:$0xff]   ;;  %s1986_s24 = sshll.u32 %s2946_s27, 8 }
  0x5c   : > { %904 = vmatprep.subr.bf16.mxu0 %v2771_v0  ;;  %2395 = vmatprep.subr.bf16.mxu1 %v2771_v0  ;;  %v2509_v3 = vld [vmem:[#allocation6 + $0x10] sm:$0xff]   ;;  %v2510_v4 = vld [vmem:[#allocation6 + $0x18] sm:$0xff]   ;;  %v2511_v5 = vld [vmem:[#allocation6 + $0x20] sm:$0xff]   ;;  %s3066_s9 = scalar_lea.vmem [#allocation8], %s1986_s24  ;;  %s2203_s10 = sshll.u32 %s2755_s15, 12 }
  0x5d   : > { %905 = vmatpush1.bf16.msra.mxu0 %v2507_v1  ;;  %2411 = vmatpush1.bf16.msra.mxu1 %v2507_v1  ;;  %v2525_v6 = vld [vmem:[%s2950_s6 + $0x4] ss:$8 sps:$4 sm:$0xff]   ;;  %v2513_v9 = vld [vmem:[#allocation6 + $0x30] sm:$0xff]   ;;  %v2514_v10 = vld [vmem:[#allocation6 + $0x38] sm:$0xff]   ;;  %s1858_s11 = sshll.u32 %s3066_s9, 4  ;;  %s3163_s7 = scalar_lea.hbm %s3218_s3, %s2203_s10  ;;  %s3165_s11 = int_to_ptr.vmem [resolvable:$true] %s1858_s11 }
  0x5e   : > { %906 = vmatprep.subr.bf16.mxu0 %v2771_v0  ;;  %2396 = vmatprep.subr.bf16.mxu1 %v2771_v0  ;;  %v2512_v7 = vld [vmem:[#allocation6 + $0x28] sm:$0xff]   ;;  %v2515_v11 = vld [vmem:[#allocation6 + $0x40] sm:$0xff]   ;;  %v2517_v13 = vld [vmem:[#allocation6 + $0x50] sm:$0xff]   ;;  %s1844_s15 = scalar_lea.sflag [#allocation5], %s2946_s27  ;;  %s2677_s8 = scalar_lea.vmem %s3165_s11, 4096 }
  0x5f   : > { %v2528_v8 = vld [vmem:[%s2950_s6 + $0x104] ss:$8 sps:$4 sm:$0xff]   ;;  %936 = vmatprep.mubr.bf16.mxu0 %v2525_v6  ;;  %v2518_v14 = vld [vmem:[#allocation6 + $0x58] sm:$0xff]   ;;  %v2521_v17 = vld [vmem:[#allocation6 + $0x70] sm:$0xff]   ;;  %p2678_p4 = scmp.ne.s32.totalorder %s3165_s11, %s2677_s8  ;;  %s2772_s21 = smov [#allocation8]  }
  0x60   : > { %1064 = vmatprep.mubr.bf16.mxu1 %v2528_v8  ;;  %v2516_v12 = vld [vmem:[#allocation6 + $0x48] sm:$0xff]   ;;  %v2519_v15 = vld [vmem:[#allocation6 + $0x60] sm:$0xff]   ;;  %v2522_v18 = vld [vmem:[#allocation6 + $0x78] sm:$0xff]   ;;  %s2681_s19 = sshll.u32 %s2772_s21, 4  ;;  %s2682_s19 = int_to_ptr.vmem [resolvable:$false] %s2681_s19 }
  0x61   : > { %907 = vmatpush1.bf16.msra.mxu0 %v2508_v2  ;;  %2412 = vmatpush1.bf16.msra.mxu1 %v2508_v2  ;;  %v2520_v16 = vld [vmem:[#allocation6 + $0x68] sm:$0xff]   ;;  %v2529_v21 = vld [vmem:[%s2950_s6 + $0x14] ss:$8 sps:$4 sm:$0xff]   ;;  %v2533_v23 = vld [vmem:[%s2950_s6 + $0x10] ss:$8 sps:$4 sm:$0xff]   ;;  %p2679_p6 = pnand %p2678_p4, %p2890_p11  ;;  %s2683_s25 = scalar_lea.vmem %s2682_s19, 8192 }
  0x62   : > { %908 = vmatprep.subr.bf16.mxu0 %v2771_v0  ;;  %2397 = vmatprep.subr.bf16.mxu1 %v2771_v0  ;;  %v2523_v19 = vld [vmem:[%s2950_s6] ss:$8 sps:$4 sm:$0xff]   ;;  %v2531_v22 = vld [vmem:[%s2950_s6 + $0x114] ss:$8 sps:$4 sm:$0xff]   ;;  %v2534_v24 = vld [vmem:[%s2950_s6 + $0x110] ss:$8 sps:$4 sm:$0xff]   ;;  %p2684_p12 = scmp.lt.s32.totalorder %s3165_s11, %s2682_s19  ;;  %p2685_p10 = scmp.lt.s32.totalorder %s2683_s25, %s2677_s8 }
  0x63   : > { %v2526_v20 = vld [vmem:[%s2950_s6 + $0x100] ss:$8 sps:$4 sm:$0xff]   ;;  %v2535_v25 = vld [vmem:[%s2950_s6 + $0x24] ss:$8 sps:$4 sm:$0xff]   ;;  %v2541_v29 = vld [vmem:[%s2950_s6 + $0x34] ss:$8 sps:$4 sm:$0xff]   ;;  %p2680_p8 = pneg %p2679_p6 }
  0x64   : > { %v2537_v26 = vld [vmem:[%s2950_s6 + $0x124] ss:$8 sps:$4 sm:$0xff]   ;;  %v2539_v27 = vld [vmem:[%s2950_s6 + $0x20] ss:$8 sps:$4 sm:$0xff]   ;;  %v2543_v30 = vld [vmem:[%s2950_s6 + $0x134] ss:$8 sps:$4 sm:$0xff]   ;;  %p2686_p0 = por %p2685_p10, %p2684_p12 }
  0x65   : > { %909 = vmatpush1.bf16.msra.mxu0 %v2509_v3  ;;  %2413 = vmatpush1.bf16.msra.mxu1 %v2509_v3  ;;  %v2540_v28 = vld [vmem:[%s2950_s6 + $0x120] ss:$8 sps:$4 sm:$0xff]   ;;  %v2545_v31 = vld [vmem:[%s2950_s6 + $0x30] ss:$8 sps:$4 sm:$0xff]   ;;  %v2547_v33 = vld [vmem:[%s2950_s6 + $0x44] ss:$8 sps:$4 sm:$0xff]  }
  0x66   : > { %910 = vmatprep.subr.bf16.mxu0 %v2771_v0  ;;  %2398 = vmatprep.subr.bf16.mxu1 %v2771_v0  ;;  %v2546_v32 = vld [vmem:[%s2950_s6 + $0x130] ss:$8 sps:$4 sm:$0xff]   ;;  %v2549_v34 = vld [vmem:[%s2950_s6 + $0x144] ss:$8 sps:$4 sm:$0xff]   ;;  %v2551_v35 = vld [vmem:[%s2950_s6 + $0x40] ss:$8 sps:$4 sm:$0xff]   ;;  %p2687_p5 = pnand %p2686_p0, %p2680_p8 }
  0x67   : > { %v2552_v36 = vld [vmem:[%s2950_s6 + $0x140] ss:$8 sps:$4 sm:$0xff]   ;;  %v2553_v37 = vld [vmem:[%s2950_s6 + $0x54] ss:$8 sps:$4 sm:$0xff]   ;;  %v2557_v39 = vld [vmem:[%s2950_s6 + $0x50] ss:$8 sps:$4 sm:$0xff]  }
  0x68   : > { %v2555_v38 = vld [vmem:[%s2950_s6 + $0x154] ss:$8 sps:$4 sm:$0xff]   ;;  %v2558_v40 = vld [vmem:[%s2950_s6 + $0x150] ss:$8 sps:$4 sm:$0xff]   ;;  %v2559_v41 = vld [vmem:[%s2950_s6 + $0x64] ss:$8 sps:$4 sm:$0xff]  }
  0x69   : > { %911 = vmatpush1.bf16.msra.mxu0 %v2510_v4  ;;  %2414 = vmatpush1.bf16.msra.mxu1 %v2510_v4  ;;  %v2561_v42 = vld [vmem:[%s2950_s6 + $0x164] ss:$8 sps:$4 sm:$0xff]   ;;  %v2563_v43 = vld [vmem:[%s2950_s6 + $0x60] ss:$8 sps:$4 sm:$0xff]   ;;  %v2565_v45 = vld [vmem:[%s2950_s6 + $0x74] ss:$8 sps:$4 sm:$0xff]  }
  0x6a   : > { %912 = vmatprep.subr.bf16.mxu0 %v2771_v0  ;;  %2399 = vmatprep.subr.bf16.mxu1 %v2771_v0  ;;  %v2564_v44 = vld [vmem:[%s2950_s6 + $0x160] ss:$8 sps:$4 sm:$0xff]   ;;  %v2567_v46 = vld [vmem:[%s2950_s6 + $0x174] ss:$8 sps:$4 sm:$0xff]   ;;  %v2569_v47 = vld [vmem:[%s2950_s6 + $0x70] ss:$8 sps:$4 sm:$0xff]  }
  0x6b   : > { %v2570_v48 = vld [vmem:[%s2950_s6 + $0x170] ss:$8 sps:$4 sm:$0xff]   ;;  %v2571_v49 = vld [vmem:[%s2950_s6 + $0x84] ss:$8 sps:$4 sm:$0xff]   ;;  %v2575_v51 = vld [vmem:[%s2950_s6 + $0x80] ss:$8 sps:$4 sm:$0xff]  }
  0x6c   : > { %v2573_v50 = vld [vmem:[%s2950_s6 + $0x184] ss:$8 sps:$4 sm:$0xff]   ;;  %v2576_v52 = vld [vmem:[%s2950_s6 + $0x180] ss:$8 sps:$4 sm:$0xff]   ;;  %v2577_v53 = vld [vmem:[%s2950_s6 + $0x94] ss:$8 sps:$4 sm:$0xff]  }
  0x6d   : > { %913 = vmatpush1.bf16.msra.mxu0 %v2511_v5  ;;  %2415 = vmatpush1.bf16.msra.mxu1 %v2511_v5  ;;  %v2579_v54 = vld [vmem:[%s2950_s6 + $0x194] ss:$8 sps:$4 sm:$0xff]   ;;  %v2581_v55 = vld [vmem:[%s2950_s6 + $0x90] ss:$8 sps:$4 sm:$0xff]   ;;  %v2583_v57 = vld [vmem:[%s2950_s6 + $0xa4] ss:$8 sps:$4 sm:$0xff]  }
  0x6e   : > { %914 = vmatprep.subr.bf16.mxu0 %v2771_v0  ;;  %2400 = vmatprep.subr.bf16.mxu1 %v2771_v0  ;;  %v2582_v56 = vld [vmem:[%s2950_s6 + $0x190] ss:$8 sps:$4 sm:$0xff]   ;;  %v2585_v58 = vld [vmem:[%s2950_s6 + $0x1a4] ss:$8 sps:$4 sm:$0xff]   ;;  %v2587_v59 = vld [vmem:[%s2950_s6 + $0xa0] ss:$8 sps:$4 sm:$0xff]  }
  0x6f   : > { %v2588_v60 = vld [vmem:[%s2950_s6 + $0x1a0] ss:$8 sps:$4 sm:$0xff]   ;;  %v2589_v61 = vld [vmem:[%s2950_s6 + $0xb4] ss:$8 sps:$4 sm:$0xff]   ;;  %v2593_v63 = vld [vmem:[%s2950_s6 + $0xb0] ss:$8 sps:$4 sm:$0xff]  }
  0x70   : > { %v2591_v62 = vld [vmem:[%s2950_s6 + $0x1b4] ss:$8 sps:$4 sm:$0xff]   ;;  %v2595_v1 = vld [vmem:[%s2950_s6 + $0xc4] ss:$8 sps:$4 sm:$0xff]   ;;  %v2599_v3 = vld [vmem:[%s2950_s6 + $0xc0] ss:$8 sps:$4 sm:$0xff]  }
  0x71   : > { %915 = vmatpush1.bf16.msra.mxu0 %v2512_v7  ;;  %2416 = vmatpush1.bf16.msra.mxu1 %v2512_v7  ;;  %v2597_v2 = vld [vmem:[%s2950_s6 + $0x1c4] ss:$8 sps:$4 sm:$0xff]   ;;  %v2600_v4 = vld [vmem:[%s2950_s6 + $0x1c0] ss:$8 sps:$4 sm:$0xff]   ;;  %v2601_v5 = vld [vmem:[%s2950_s6 + $0xd4] ss:$8 sps:$4 sm:$0xff]  }
  0x72   : > { %916 = vmatprep.subr.bf16.mxu0 %v2771_v0  ;;  %2401 = vmatprep.subr.bf16.mxu1 %v2771_v0  ;;  %v2603_v6 = vld [vmem:[%s2950_s6 + $0x1d4] ss:$8 sps:$4 sm:$0xff]   ;;  %v2605_v7 = vld [vmem:[%s2950_s6 + $0xd0] ss:$8 sps:$4 sm:$0xff]  }
  0x73   : > { %v2606_v8 = vld [vmem:[%s2950_s6 + $0x1d0] ss:$8 sps:$4 sm:$0xff]  }
  0x75   : > { %917 = vmatpush1.bf16.msra.mxu0 %v2513_v9  ;;  %2417 = vmatpush1.bf16.msra.mxu1 %v2513_v9  ;;  %v2607_v9 = vld [vmem:[%s2950_s6 + $0xe4] ss:$8 sps:$4 sm:$0xff]  }
  0x76   : > { %918 = vmatprep.subr.bf16.mxu0 %v2771_v0  ;;  %2402 = vmatprep.subr.bf16.mxu1 %v2771_v0 }
  0x79   : > { %919 = vmatpush1.bf16.msra.mxu0 %v2514_v10  ;;  %2418 = vmatpush1.bf16.msra.mxu1 %v2514_v10  ;;  %v2609_v10 = vld [vmem:[%s2950_s6 + $0x1e4] ss:$8 sps:$4 sm:$0xff]  }
  0x7a   : > { %920 = vmatprep.subr.bf16.mxu0 %v2771_v0  ;;  %2403 = vmatprep.subr.bf16.mxu1 %v2771_v0 }
  0x7d   : > { %921 = vmatpush1.bf16.msra.mxu0 %v2515_v11  ;;  %2419 = vmatpush1.bf16.msra.mxu1 %v2515_v11  ;;  %v2611_v11 = vld [vmem:[%s2950_s6 + $0xe0] ss:$8 sps:$4 sm:$0xff]  }
  0x7e   : > { %922 = vmatprep.subr.bf16.mxu0 %v2771_v0  ;;  %2404 = vmatprep.subr.bf16.mxu1 %v2771_v0 }
  0x81   : > { %923 = vmatpush1.bf16.msra.mxu0 %v2516_v12  ;;  %2420 = vmatpush1.bf16.msra.mxu1 %v2516_v12  ;;  %v2612_v12 = vld [vmem:[%s2950_s6 + $0x1e0] ss:$8 sps:$4 sm:$0xff]  }
  0x82   : > { %924 = vmatprep.subr.bf16.mxu0 %v2771_v0  ;;  %2405 = vmatprep.subr.bf16.mxu1 %v2771_v0 }
  0x85   : > { %925 = vmatpush1.bf16.msra.mxu0 %v2517_v13  ;;  %2421 = vmatpush1.bf16.msra.mxu1 %v2517_v13  ;;  %v2613_v13 = vld [vmem:[%s2950_s6 + $0xf4] ss:$8 sps:$4 sm:$0xff]  }
  0x86   : > { %926 = vmatprep.subr.bf16.mxu0 %v2771_v0  ;;  %2406 = vmatprep.subr.bf16.mxu1 %v2771_v0 }
  0x89   : > { %927 = vmatpush1.bf16.msra.mxu0 %v2518_v14  ;;  %2422 = vmatpush1.bf16.msra.mxu1 %v2518_v14  ;;  %v2615_v14 = vld [vmem:[%s2950_s6 + $0x1f4] ss:$8 sps:$4 sm:$0xff]  }
  0x8a   : > { %928 = vmatprep.subr.bf16.mxu0 %v2771_v0  ;;  %2407 = vmatprep.subr.bf16.mxu1 %v2771_v0 }
  0x8d   : > { %929 = vmatpush1.bf16.msra.mxu0 %v2519_v15  ;;  %2423 = vmatpush1.bf16.msra.mxu1 %v2519_v15  ;;  %v2617_v15 = vld [vmem:[%s2950_s6 + $0xf0] ss:$8 sps:$4 sm:$0xff]  }
  0x8e   : > { %930 = vmatprep.subr.bf16.mxu0 %v2771_v0  ;;  %2408 = vmatprep.subr.bf16.mxu1 %v2771_v0 }
  0x91   : > { %931 = vmatpush1.bf16.msra.mxu0 %v2520_v16  ;;  %2424 = vmatpush1.bf16.msra.mxu1 %v2520_v16  ;;  %v2618_v16 = vld [vmem:[%s2950_s6 + $0x1f0] ss:$8 sps:$4 sm:$0xff]  }
  0x92   : > { %932 = vmatprep.subr.bf16.mxu0 %v2771_v0  ;;  %2409 = vmatprep.subr.bf16.mxu1 %v2771_v0 }
  0x95   : > { %933 = vmatpush1.bf16.msra.mxu0 %v2521_v17  ;;  %2425 = vmatpush1.bf16.msra.mxu1 %v2521_v17  ;;  %v3059_v17 = vld [vmem:[%s3217_s2] ss:$0 sm:$0xff] }
  0x96   : > { %934 = vmatprep.subr.bf16.mxu0 %v2771_v0  ;;  %2410 = vmatprep.subr.bf16.mxu1 %v2771_v0  ;;  %v2594_v0 = vld [vmem:[%s2950_s6 + $0x1b0] ss:$8 sps:$4 sm:$0xff]  }
  0x99   : > { %935 = vmatpush1.bf16.msra.mxu0 %v2522_v18  ;;  %2426 = vmatpush1.bf16.msra.mxu1 %v2522_v18 }
  0x9c   : > { %937 = vmatmul.mubr.bf16.vlgmr.msra.gmra.mrb[0].mxu0 %v2523_v19  ;;  %1065 = vmatmul.mubr.bf16.vlgmr.msra.gmra.mrb[0].mxu1 %v2526_v20 }
  0x9d   : > { %944 = vmatprep.mubr.bf16.mxu0 %v2529_v21  ;;  %1072 = vmatprep.mubr.bf16.mxu1 %v2531_v22 }
  0xa4   : > { %945 = vmatmul.mubr.bf16.gmra.mrb[4].mxu0 %v2533_v23  ;;  %1073 = vmatmul.mubr.bf16.gmra.mrb[4].mxu1 %v2534_v24 }
  0xa5   : > { %952 = vmatprep.mubr.bf16.mxu0 %v2535_v25  ;;  %1080 = vmatprep.mubr.bf16.mxu1 %v2537_v26 }
  0xac   : > { %953 = vmatmul.mubr.bf16.gmra.mrb[8].mxu0 %v2539_v27  ;;  %1081 = vmatmul.mubr.bf16.gmra.mrb[8].mxu1 %v2540_v28 }
  0xad   : > { %960 = vmatprep.mubr.bf16.mxu0 %v2541_v29  ;;  %1088 = vmatprep.mubr.bf16.mxu1 %v2543_v30 }
  0xb4   : > { %961 = vmatmul.mubr.bf16.gmra.mrb[12].mxu0 %v2545_v31  ;;  %1089 = vmatmul.mubr.bf16.gmra.mrb[12].mxu1 %v2546_v32 }
  0xb5   : > { %968 = vmatprep.mubr.bf16.mxu0 %v2547_v33  ;;  %1096 = vmatprep.mubr.bf16.mxu1 %v2549_v34 }
  0xbc   : > { %969 = vmatmul.mubr.bf16.gmra.mrb[16].mxu0 %v2551_v35  ;;  %1097 = vmatmul.mubr.bf16.gmra.mrb[16].mxu1 %v2552_v36 }
  0xbd   : > { %976 = vmatprep.mubr.bf16.mxu0 %v2553_v37  ;;  %1104 = vmatprep.mubr.bf16.mxu1 %v2555_v38 }
  0xc4   : > { %977 = vmatmul.mubr.bf16.gmra.mrb[20].mxu0 %v2557_v39  ;;  %1105 = vmatmul.mubr.bf16.gmra.mrb[20].mxu1 %v2558_v40 }
  0xc5   : > { %984 = vmatprep.mubr.bf16.mxu0 %v2559_v41  ;;  %1112 = vmatprep.mubr.bf16.mxu1 %v2561_v42 }
  0xcc   : > { %985 = vmatmul.mubr.bf16.gmra.mrb[24].mxu0 %v2563_v43  ;;  %1113 = vmatmul.mubr.bf16.gmra.mrb[24].mxu1 %v2564_v44 }
  0xcd   : > { %992 = vmatprep.mubr.bf16.mxu0 %v2565_v45  ;;  %1120 = vmatprep.mubr.bf16.mxu1 %v2567_v46 }
  0xd4   : > { %993 = vmatmul.mubr.bf16.gmra.mrb[28].mxu0 %v2569_v47  ;;  %1121 = vmatmul.mubr.bf16.gmra.mrb[28].mxu1 %v2570_v48 }
  0xd5   : > { %1000 = vmatprep.mubr.bf16.mxu0 %v2571_v49  ;;  %1128 = vmatprep.mubr.bf16.mxu1 %v2573_v50 }
  0xdc   : > { %1001 = vmatmul.mubr.bf16.gmra.mrb[32].mxu0 %v2575_v51  ;;  %1129 = vmatmul.mubr.bf16.gmra.mrb[32].mxu1 %v2576_v52 }
  0xdd   : > { %1008 = vmatprep.mubr.bf16.mxu0 %v2577_v53  ;;  %1136 = vmatprep.mubr.bf16.mxu1 %v2579_v54 }
  0xe4   : > { %1009 = vmatmul.mubr.bf16.gmra.mrb[36].mxu0 %v2581_v55  ;;  %1137 = vmatmul.mubr.bf16.gmra.mrb[36].mxu1 %v2582_v56 }
  0xe5   : > { %1016 = vmatprep.mubr.bf16.mxu0 %v2583_v57  ;;  %1144 = vmatprep.mubr.bf16.mxu1 %v2585_v58 }
  0xec   : > { %1017 = vmatmul.mubr.bf16.gmra.mrb[40].mxu0 %v2587_v59  ;;  %1145 = vmatmul.mubr.bf16.gmra.mrb[40].mxu1 %v2588_v60 }
  0xed   : > { %1024 = vmatprep.mubr.bf16.mxu0 %v2589_v61  ;;  %1152 = vmatprep.mubr.bf16.mxu1 %v2591_v62 }
  0xf4   : > { %1025 = vmatmul.mubr.bf16.gmra.mrb[44].mxu0 %v2593_v63  ;;  %1153 = vmatmul.mubr.bf16.gmra.mrb[44].mxu1 %v2594_v0 }
  0xf5   : > { %1032 = vmatprep.mubr.bf16.mxu0 %v2595_v1  ;;  %1160 = vmatprep.mubr.bf16.mxu1 %v2597_v2 }
  0xfc   : > { %1033 = vmatmul.mubr.bf16.gmra.mrb[48].mxu0 %v2599_v3  ;;  %1161 = vmatmul.mubr.bf16.gmra.mrb[48].mxu1 %v2600_v4 }
  0xfd   : > { %1040 = vmatprep.mubr.bf16.mxu0 %v2601_v5  ;;  %1168 = vmatprep.mubr.bf16.mxu1 %v2603_v6 }
 0x104   : > { %1041 = vmatmul.mubr.bf16.gmra.mrb[52].mxu0 %v2605_v7  ;;  %1169 = vmatmul.mubr.bf16.gmra.mrb[52].mxu1 %v2606_v8 }
 0x105   : > { %1048 = vmatprep.mubr.bf16.mxu0 %v2607_v9  ;;  %1176 = vmatprep.mubr.bf16.mxu1 %v2609_v10 }
 0x10c   : > { %1049 = vmatmul.mubr.bf16.gmra.mrb[56].mxu0 %v2611_v11  ;;  %1177 = vmatmul.mubr.bf16.gmra.mrb[56].mxu1 %v2612_v12 }
 0x10d   : > { %1056 = vmatprep.mubr.bf16.mxu0 %v2613_v13  ;;  %1184 = vmatprep.mubr.bf16.mxu1 %v2615_v14 }
 0x114   : > { %1057 = vmatmul.mubr.bf16.gmra.mrb[60].mxu0 %v2617_v15  ;;  %1185 = vmatmul.mubr.bf16.gmra.mrb[60].mxu1 %v2618_v16 }
 0x16f   : > { %v938_v18 = vpop.f32.mrb[0].mxu0  ;;  %v1066_v19 = vpop.f32.mrb[0].mxu1 }
 0x170   : > { %v1395_v20 = vadd.f32 %v3059_v17, %v938_v18  ;;  %v1427_v21 = vadd.f32 %v3059_v17, %v1066_v19  ;;  %v940_v22 = vpop.f32.mrb[1].mxu0  ;;  %v1068_v23 = vpop.f32.mrb[1].mxu1 }
 0x171   : > { %v941_v24 = vpop.f32.mrb[2].mxu0  ;;  %v1069_v25 = vpop.f32.mrb[2].mxu1 }
 0x172   : > { %v1396_v26 = vadd.f32 %v3059_v17, %v941_v24  ;;  %v1428_v27 = vadd.f32 %v3059_v17, %v1069_v25  ;;  %v943_v28 = vpop.f32.mrb[3].mxu0  ;;  %v1071_v29 = vpop.f32.mrb[3].mxu1  ;;  %v1459_v30 = vmax.f32 %v1395_v20, 0.0  ;;  %v1491_v31 = vmax.f32 %v1427_v21, 0.0 }
 0x174   : > { %v1460_v32 = vmax.f32 %v1396_v26, 0.0  ;;  %v1492_v33 = vmax.f32 %v1428_v27, 0.0 }
 0x176   : > { %v2207_v34 = vpack.c.bf16 %v1460_v32, %v1459_v30  ;;  %v2287_v35 = vpack.c.bf16 %v1492_v33, %v1491_v31 }
 0x177   : > { %v946_v36 = vpop.f32.mrb[4].mxu0  ;;  %v1074_v37 = vpop.f32.mrb[4].mxu1 }
 0x178   : > { %2208 = vst [vmem:[%s3066_s9] sm:$0xff] %v2207_v34   ;;  %2379 = vst [vmem:[%s3066_s9 + $0x80] sm:$0xff] %v2287_v35   ;;  %v1397_v38 = vadd.f32 %v3059_v17, %v946_v36  ;;  %v1429_v39 = vadd.f32 %v3059_v17, %v1074_v37  ;;  %v948_v40 = vpop.f32.mrb[5].mxu0  ;;  %v1076_v41 = vpop.f32.mrb[5].mxu1 }
 0x179   : > { %v949_v42 = vpop.f32.mrb[6].mxu0  ;;  %v1077_v43 = vpop.f32.mrb[6].mxu1 }
 0x17a   : > { %v1398_v44 = vadd.f32 %v3059_v17, %v949_v42  ;;  %v1430_v45 = vadd.f32 %v3059_v17, %v1077_v43  ;;  %v951_v46 = vpop.f32.mrb[7].mxu0  ;;  %v1079_v47 = vpop.f32.mrb[7].mxu1  ;;  %v1461_v48 = vmax.f32 %v1397_v38, 0.0  ;;  %v1493_v49 = vmax.f32 %v1429_v39, 0.0 }
 0x17c   : > { %v1462_v50 = vmax.f32 %v1398_v44, 0.0  ;;  %v1494_v51 = vmax.f32 %v1430_v45, 0.0 }
 0x17e   : > { %v2212_v52 = vpack.c.bf16 %v1462_v50, %v1461_v48  ;;  %v2292_v53 = vpack.c.bf16 %v1494_v51, %v1493_v49 }
 0x17f   : > { %v954_v54 = vpop.f32.mrb[8].mxu0  ;;  %v1082_v55 = vpop.f32.mrb[8].mxu1 }
 0x180   : > { %2364 = vst [vmem:[%s3066_s9 + $0x8] sm:$0xff] %v2212_v52   ;;  %2380 = vst [vmem:[%s3066_s9 + $0x88] sm:$0xff] %v2292_v53   ;;  %v1399_v56 = vadd.f32 %v3059_v17, %v954_v54  ;;  %v1431_v57 = vadd.f32 %v3059_v17, %v1082_v55  ;;  %v956_v58 = vpop.f32.mrb[9].mxu0  ;;  %v1084_v59 = vpop.f32.mrb[9].mxu1 }
 0x181   : > { %v957_v60 = vpop.f32.mrb[10].mxu0  ;;  %v1085_v61 = vpop.f32.mrb[10].mxu1 }
 0x182   : > { %v1400_v62 = vadd.f32 %v3059_v17, %v957_v60  ;;  %v1432_v63 = vadd.f32 %v3059_v17, %v1085_v61  ;;  %v959_v0 = vpop.f32.mrb[11].mxu0  ;;  %v1087_v1 = vpop.f32.mrb[11].mxu1  ;;  %v1463_v2 = vmax.f32 %v1399_v56, 0.0  ;;  %v1495_v3 = vmax.f32 %v1431_v57, 0.0 }
 0x184   : > { %v1464_v4 = vmax.f32 %v1400_v62, 0.0  ;;  %v1496_v5 = vmax.f32 %v1432_v63, 0.0 }
 0x186   : > { %v2217_v6 = vpack.c.bf16 %v1464_v4, %v1463_v2  ;;  %v2297_v7 = vpack.c.bf16 %v1496_v5, %v1495_v3 }
 0x187   : > { %v962_v8 = vpop.f32.mrb[12].mxu0  ;;  %v1090_v9 = vpop.f32.mrb[12].mxu1 }
 0x188   : > { %2365 = vst [vmem:[%s3066_s9 + $0x10] sm:$0xff] %v2217_v6   ;;  %2381 = vst [vmem:[%s3066_s9 + $0x90] sm:$0xff] %v2297_v7   ;;  %v1401_v10 = vadd.f32 %v3059_v17, %v962_v8  ;;  %v1433_v11 = vadd.f32 %v3059_v17, %v1090_v9  ;;  %v964_v12 = vpop.f32.mrb[13].mxu0  ;;  %v1092_v13 = vpop.f32.mrb[13].mxu1 }
 0x189   : > { %v965_v14 = vpop.f32.mrb[14].mxu0  ;;  %v1093_v15 = vpop.f32.mrb[14].mxu1 }
 0x18a   : > { %v1402_v16 = vadd.f32 %v3059_v17, %v965_v14  ;;  %v1434_v18 = vadd.f32 %v3059_v17, %v1093_v15  ;;  %v967_v19 = vpop.f32.mrb[15].mxu0  ;;  %v1095_v20 = vpop.f32.mrb[15].mxu1  ;;  %v1465_v21 = vmax.f32 %v1401_v10, 0.0  ;;  %v1497_v22 = vmax.f32 %v1433_v11, 0.0 }
 0x18c   : > { %v1466_v23 = vmax.f32 %v1402_v16, 0.0  ;;  %v1498_v24 = vmax.f32 %v1434_v18, 0.0 }
 0x18e   : > { %v2222_v25 = vpack.c.bf16 %v1466_v23, %v1465_v21  ;;  %v2302_v26 = vpack.c.bf16 %v1498_v24, %v1497_v22 }
 0x18f   : > { %v970_v27 = vpop.f32.mrb[16].mxu0  ;;  %v1098_v28 = vpop.f32.mrb[16].mxu1 }
 0x190   : > { %2366 = vst [vmem:[%s3066_s9 + $0x18] sm:$0xff] %v2222_v25   ;;  %2382 = vst [vmem:[%s3066_s9 + $0x98] sm:$0xff] %v2302_v26   ;;  %v1403_v29 = vadd.f32 %v3059_v17, %v970_v27  ;;  %v1435_v30 = vadd.f32 %v3059_v17, %v1098_v28  ;;  %v972_v31 = vpop.f32.mrb[17].mxu0  ;;  %v1100_v32 = vpop.f32.mrb[17].mxu1 }
 0x191   : > { %v973_v33 = vpop.f32.mrb[18].mxu0  ;;  %v1101_v34 = vpop.f32.mrb[18].mxu1 }
 0x192   : > { %v1404_v35 = vadd.f32 %v3059_v17, %v973_v33  ;;  %v1436_v36 = vadd.f32 %v3059_v17, %v1101_v34  ;;  %v975_v37 = vpop.f32.mrb[19].mxu0  ;;  %v1103_v38 = vpop.f32.mrb[19].mxu1  ;;  %v1467_v39 = vmax.f32 %v1403_v29, 0.0  ;;  %v1499_v40 = vmax.f32 %v1435_v30, 0.0 }
 0x194   : > { %v1468_v41 = vmax.f32 %v1404_v35, 0.0  ;;  %v1500_v42 = vmax.f32 %v1436_v36, 0.0 }
 0x196   : > { %v2227_v43 = vpack.c.bf16 %v1468_v41, %v1467_v39  ;;  %v2307_v44 = vpack.c.bf16 %v1500_v42, %v1499_v40 }
 0x197   : > { %v978_v45 = vpop.f32.mrb[20].mxu0  ;;  %v1106_v46 = vpop.f32.mrb[20].mxu1 }
 0x198   : > { %2367 = vst [vmem:[%s3066_s9 + $0x20] sm:$0xff] %v2227_v43   ;;  %2383 = vst [vmem:[%s3066_s9 + $0xa0] sm:$0xff] %v2307_v44   ;;  %v1405_v47 = vadd.f32 %v3059_v17, %v978_v45  ;;  %v1437_v48 = vadd.f32 %v3059_v17, %v1106_v46  ;;  %v980_v49 = vpop.f32.mrb[21].mxu0  ;;  %v1108_v50 = vpop.f32.mrb[21].mxu1 }
 0x199   : > { %v981_v51 = vpop.f32.mrb[22].mxu0  ;;  %v1109_v52 = vpop.f32.mrb[22].mxu1 }
 0x19a   : > { %v1406_v53 = vadd.f32 %v3059_v17, %v981_v51  ;;  %v1438_v54 = vadd.f32 %v3059_v17, %v1109_v52  ;;  %v983_v55 = vpop.f32.mrb[23].mxu0  ;;  %v1111_v56 = vpop.f32.mrb[23].mxu1  ;;  %v1469_v57 = vmax.f32 %v1405_v47, 0.0  ;;  %v1501_v58 = vmax.f32 %v1437_v48, 0.0 }
 0x19c   : > { %v1470_v59 = vmax.f32 %v1406_v53, 0.0  ;;  %v1502_v60 = vmax.f32 %v1438_v54, 0.0 }
 0x19e   : > { %v2232_v61 = vpack.c.bf16 %v1470_v59, %v1469_v57  ;;  %v2312_v62 = vpack.c.bf16 %v1502_v60, %v1501_v58 }
 0x19f   : > { %v986_v63 = vpop.f32.mrb[24].mxu0  ;;  %v1114_v0 = vpop.f32.mrb[24].mxu1 }
 0x1a0   : > { %2368 = vst [vmem:[%s3066_s9 + $0x28] sm:$0xff] %v2232_v61   ;;  %2384 = vst [vmem:[%s3066_s9 + $0xa8] sm:$0xff] %v2312_v62   ;;  %v1407_v1 = vadd.f32 %v3059_v17, %v986_v63  ;;  %v1439_v2 = vadd.f32 %v3059_v17, %v1114_v0  ;;  %v988_v3 = vpop.f32.mrb[25].mxu0  ;;  %v1116_v4 = vpop.f32.mrb[25].mxu1 }
 0x1a1   : > { %v989_v5 = vpop.f32.mrb[26].mxu0  ;;  %v1117_v6 = vpop.f32.mrb[26].mxu1 }
 0x1a2   : > { %v1408_v7 = vadd.f32 %v3059_v17, %v989_v5  ;;  %v1440_v8 = vadd.f32 %v3059_v17, %v1117_v6  ;;  %v991_v9 = vpop.f32.mrb[27].mxu0  ;;  %v1119_v10 = vpop.f32.mrb[27].mxu1  ;;  %v1471_v11 = vmax.f32 %v1407_v1, 0.0  ;;  %v1503_v12 = vmax.f32 %v1439_v2, 0.0 }
 0x1a4   : > { %v1472_v13 = vmax.f32 %v1408_v7, 0.0  ;;  %v1504_v14 = vmax.f32 %v1440_v8, 0.0 }
 0x1a6   : > { %v2237_v15 = vpack.c.bf16 %v1472_v13, %v1471_v11  ;;  %v2317_v16 = vpack.c.bf16 %v1504_v14, %v1503_v12 }
 0x1a7   : > { %v994_v18 = vpop.f32.mrb[28].mxu0  ;;  %v1122_v19 = vpop.f32.mrb[28].mxu1 }
 0x1a8   : > { %2369 = vst [vmem:[%s3066_s9 + $0x30] sm:$0xff] %v2237_v15   ;;  %2385 = vst [vmem:[%s3066_s9 + $0xb0] sm:$0xff] %v2317_v16   ;;  %v1409_v20 = vadd.f32 %v3059_v17, %v994_v18  ;;  %v1441_v21 = vadd.f32 %v3059_v17, %v1122_v19  ;;  %v996_v22 = vpop.f32.mrb[29].mxu0  ;;  %v1124_v23 = vpop.f32.mrb[29].mxu1 }
 0x1a9   : > { %v997_v24 = vpop.f32.mrb[30].mxu0  ;;  %v1125_v25 = vpop.f32.mrb[30].mxu1 }
 0x1aa   : > { %v1410_v26 = vadd.f32 %v3059_v17, %v997_v24  ;;  %v1442_v27 = vadd.f32 %v3059_v17, %v1125_v25  ;;  %v999_v28 = vpop.f32.mrb[31].mxu0  ;;  %v1127_v29 = vpop.f32.mrb[31].mxu1  ;;  %v1473_v30 = vmax.f32 %v1409_v20, 0.0  ;;  %v1505_v31 = vmax.f32 %v1441_v21, 0.0 }
 0x1ac   : > { %v1474_v32 = vmax.f32 %v1410_v26, 0.0  ;;  %v1506_v33 = vmax.f32 %v1442_v27, 0.0 }
 0x1ae   : > { %v2242_v34 = vpack.c.bf16 %v1474_v32, %v1473_v30  ;;  %v2322_v35 = vpack.c.bf16 %v1506_v33, %v1505_v31 }
 0x1af   : > { %v1002_v36 = vpop.f32.mrb[32].mxu0  ;;  %v1130_v37 = vpop.f32.mrb[32].mxu1 }
 0x1b0   : > { %2370 = vst [vmem:[%s3066_s9 + $0x38] sm:$0xff] %v2242_v34   ;;  %2386 = vst [vmem:[%s3066_s9 + $0xb8] sm:$0xff] %v2322_v35   ;;  %v1411_v38 = vadd.f32 %v3059_v17, %v1002_v36  ;;  %v1443_v39 = vadd.f32 %v3059_v17, %v1130_v37  ;;  %v1004_v40 = vpop.f32.mrb[33].mxu0  ;;  %v1132_v41 = vpop.f32.mrb[33].mxu1 }
 0x1b1   : > { %v1005_v42 = vpop.f32.mrb[34].mxu0  ;;  %v1133_v43 = vpop.f32.mrb[34].mxu1 }
 0x1b2   : > { %v1412_v44 = vadd.f32 %v3059_v17, %v1005_v42  ;;  %v1444_v45 = vadd.f32 %v3059_v17, %v1133_v43  ;;  %v1007_v46 = vpop.f32.mrb[35].mxu0  ;;  %v1135_v47 = vpop.f32.mrb[35].mxu1  ;;  %v1475_v48 = vmax.f32 %v1411_v38, 0.0  ;;  %v1507_v49 = vmax.f32 %v1443_v39, 0.0 }
 0x1b4   : > { %v1476_v50 = vmax.f32 %v1412_v44, 0.0  ;;  %v1508_v51 = vmax.f32 %v1444_v45, 0.0 }
 0x1b6   : > { %v2247_v52 = vpack.c.bf16 %v1476_v50, %v1475_v48  ;;  %v2327_v53 = vpack.c.bf16 %v1508_v51, %v1507_v49 }
 0x1b7   : > { %v1010_v54 = vpop.f32.mrb[36].mxu0  ;;  %v1138_v55 = vpop.f32.mrb[36].mxu1 }
 0x1b8   : > { %2371 = vst [vmem:[%s3066_s9 + $0x40] sm:$0xff] %v2247_v52   ;;  %2387 = vst [vmem:[%s3066_s9 + $0xc0] sm:$0xff] %v2327_v53   ;;  %v1413_v56 = vadd.f32 %v3059_v17, %v1010_v54  ;;  %v1445_v57 = vadd.f32 %v3059_v17, %v1138_v55  ;;  %v1012_v58 = vpop.f32.mrb[37].mxu0  ;;  %v1140_v59 = vpop.f32.mrb[37].mxu1 }
 0x1b9   : > { %v1013_v60 = vpop.f32.mrb[38].mxu0  ;;  %v1141_v61 = vpop.f32.mrb[38].mxu1 }
 0x1ba   : > { %v1414_v62 = vadd.f32 %v3059_v17, %v1013_v60  ;;  %v1446_v63 = vadd.f32 %v3059_v17, %v1141_v61  ;;  %v1015_v0 = vpop.f32.mrb[39].mxu0  ;;  %v1143_v1 = vpop.f32.mrb[39].mxu1  ;;  %v1477_v2 = vmax.f32 %v1413_v56, 0.0  ;;  %v1509_v3 = vmax.f32 %v1445_v57, 0.0 }
 0x1bc   : > { %v1478_v4 = vmax.f32 %v1414_v62, 0.0  ;;  %v1510_v5 = vmax.f32 %v1446_v63, 0.0 }
 0x1be   : > { %v2252_v6 = vpack.c.bf16 %v1478_v4, %v1477_v2  ;;  %v2332_v7 = vpack.c.bf16 %v1510_v5, %v1509_v3 }
 0x1bf   : > { %v1018_v8 = vpop.f32.mrb[40].mxu0  ;;  %v1146_v9 = vpop.f32.mrb[40].mxu1 }
 0x1c0   : > { %2372 = vst [vmem:[%s3066_s9 + $0x48] sm:$0xff] %v2252_v6   ;;  %2388 = vst [vmem:[%s3066_s9 + $0xc8] sm:$0xff] %v2332_v7   ;;  %v1415_v10 = vadd.f32 %v3059_v17, %v1018_v8  ;;  %v1447_v11 = vadd.f32 %v3059_v17, %v1146_v9  ;;  %v1020_v12 = vpop.f32.mrb[41].mxu0  ;;  %v1148_v13 = vpop.f32.mrb[41].mxu1 }
 0x1c1   : > { %v1021_v14 = vpop.f32.mrb[42].mxu0  ;;  %v1149_v15 = vpop.f32.mrb[42].mxu1 }
 0x1c2   : > { %v1416_v16 = vadd.f32 %v3059_v17, %v1021_v14  ;;  %v1448_v18 = vadd.f32 %v3059_v17, %v1149_v15  ;;  %v1023_v19 = vpop.f32.mrb[43].mxu0  ;;  %v1151_v20 = vpop.f32.mrb[43].mxu1  ;;  %v1479_v21 = vmax.f32 %v1415_v10, 0.0  ;;  %v1511_v22 = vmax.f32 %v1447_v11, 0.0 }
 0x1c4   : > { %v1480_v23 = vmax.f32 %v1416_v16, 0.0  ;;  %v1512_v24 = vmax.f32 %v1448_v18, 0.0 }
 0x1c6   : > { %v2257_v25 = vpack.c.bf16 %v1480_v23, %v1479_v21  ;;  %v2337_v26 = vpack.c.bf16 %v1512_v24, %v1511_v22 }
 0x1c7   : > { %v1026_v27 = vpop.f32.mrb[44].mxu0  ;;  %v1154_v28 = vpop.f32.mrb[44].mxu1 }
 0x1c8   : > { %2373 = vst [vmem:[%s3066_s9 + $0x50] sm:$0xff] %v2257_v25   ;;  %2389 = vst [vmem:[%s3066_s9 + $0xd0] sm:$0xff] %v2337_v26   ;;  %v1417_v29 = vadd.f32 %v3059_v17, %v1026_v27  ;;  %v1449_v30 = vadd.f32 %v3059_v17, %v1154_v28  ;;  %v1028_v31 = vpop.f32.mrb[45].mxu0  ;;  %v1156_v32 = vpop.f32.mrb[45].mxu1 }
 0x1c9   : > { %v1029_v33 = vpop.f32.mrb[46].mxu0  ;;  %v1157_v34 = vpop.f32.mrb[46].mxu1 }
 0x1ca   : > { %v1418_v35 = vadd.f32 %v3059_v17, %v1029_v33  ;;  %v1450_v36 = vadd.f32 %v3059_v17, %v1157_v34  ;;  %v1031_v37 = vpop.f32.mrb[47].mxu0  ;;  %v1159_v38 = vpop.f32.mrb[47].mxu1  ;;  %v1481_v39 = vmax.f32 %v1417_v29, 0.0  ;;  %v1513_v40 = vmax.f32 %v1449_v30, 0.0 }
 0x1cc   : > { %v1482_v41 = vmax.f32 %v1418_v35, 0.0  ;;  %v1514_v42 = vmax.f32 %v1450_v36, 0.0 }
 0x1ce   : > { %v2262_v43 = vpack.c.bf16 %v1482_v41, %v1481_v39  ;;  %v2342_v44 = vpack.c.bf16 %v1514_v42, %v1513_v40 }
 0x1cf   : > { %v1034_v45 = vpop.f32.mrb[48].mxu0  ;;  %v1162_v46 = vpop.f32.mrb[48].mxu1 }
 0x1d0   : > { %2374 = vst [vmem:[%s3066_s9 + $0x58] sm:$0xff] %v2262_v43   ;;  %2390 = vst [vmem:[%s3066_s9 + $0xd8] sm:$0xff] %v2342_v44   ;;  %v1419_v47 = vadd.f32 %v3059_v17, %v1034_v45  ;;  %v1451_v48 = vadd.f32 %v3059_v17, %v1162_v46  ;;  %v1036_v49 = vpop.f32.mrb[49].mxu0  ;;  %v1164_v50 = vpop.f32.mrb[49].mxu1 }
 0x1d1   : > { %v1037_v51 = vpop.f32.mrb[50].mxu0  ;;  %v1165_v52 = vpop.f32.mrb[50].mxu1 }
 0x1d2   : > { %v1420_v53 = vadd.f32 %v3059_v17, %v1037_v51  ;;  %v1452_v54 = vadd.f32 %v3059_v17, %v1165_v52  ;;  %v1039_v55 = vpop.f32.mrb[51].mxu0  ;;  %v1167_v56 = vpop.f32.mrb[51].mxu1  ;;  %v1483_v57 = vmax.f32 %v1419_v47, 0.0  ;;  %v1515_v58 = vmax.f32 %v1451_v48, 0.0 }
 0x1d4   : > { %v1484_v59 = vmax.f32 %v1420_v53, 0.0  ;;  %v1516_v60 = vmax.f32 %v1452_v54, 0.0 }
 0x1d6   : > { %v2267_v61 = vpack.c.bf16 %v1484_v59, %v1483_v57  ;;  %v2347_v62 = vpack.c.bf16 %v1516_v60, %v1515_v58 }
 0x1d7   : > { %v1042_v63 = vpop.f32.mrb[52].mxu0  ;;  %v1170_v0 = vpop.f32.mrb[52].mxu1 }
 0x1d8   : > { %2375 = vst [vmem:[%s3066_s9 + $0x60] sm:$0xff] %v2267_v61   ;;  %2391 = vst [vmem:[%s3066_s9 + $0xe0] sm:$0xff] %v2347_v62   ;;  %v1421_v1 = vadd.f32 %v3059_v17, %v1042_v63  ;;  %v1453_v2 = vadd.f32 %v3059_v17, %v1170_v0  ;;  %v1044_v3 = vpop.f32.mrb[53].mxu0  ;;  %v1172_v4 = vpop.f32.mrb[53].mxu1 }
 0x1d9   : > { %v1045_v5 = vpop.f32.mrb[54].mxu0  ;;  %v1173_v6 = vpop.f32.mrb[54].mxu1 }
 0x1da   : > { %v1422_v7 = vadd.f32 %v3059_v17, %v1045_v5  ;;  %v1454_v8 = vadd.f32 %v3059_v17, %v1173_v6  ;;  %v1047_v9 = vpop.f32.mrb[55].mxu0  ;;  %v1175_v10 = vpop.f32.mrb[55].mxu1  ;;  %v1485_v11 = vmax.f32 %v1421_v1, 0.0  ;;  %v1517_v12 = vmax.f32 %v1453_v2, 0.0 }
 0x1dc   : > { %v1486_v13 = vmax.f32 %v1422_v7, 0.0  ;;  %v1518_v14 = vmax.f32 %v1454_v8, 0.0 }
 0x1de   : > { %v2272_v15 = vpack.c.bf16 %v1486_v13, %v1485_v11  ;;  %v2352_v16 = vpack.c.bf16 %v1518_v14, %v1517_v12 }
 0x1df   : > { %v1050_v18 = vpop.f32.mrb[56].mxu0  ;;  %v1178_v19 = vpop.f32.mrb[56].mxu1 }
 0x1e0   : > { %2376 = vst [vmem:[%s3066_s9 + $0x68] sm:$0xff] %v2272_v15   ;;  %2392 = vst [vmem:[%s3066_s9 + $0xe8] sm:$0xff] %v2352_v16   ;;  %v1423_v20 = vadd.f32 %v3059_v17, %v1050_v18  ;;  %v1455_v21 = vadd.f32 %v3059_v17, %v1178_v19  ;;  %v1052_v22 = vpop.f32.mrb[57].mxu0  ;;  %v1180_v23 = vpop.f32.mrb[57].mxu1 }
 0x1e1   : > { %v1053_v24 = vpop.f32.mrb[58].mxu0  ;;  %v1181_v25 = vpop.f32.mrb[58].mxu1 }
 0x1e2   : > { %v1424_v26 = vadd.f32 %v3059_v17, %v1053_v24  ;;  %v1456_v27 = vadd.f32 %v3059_v17, %v1181_v25  ;;  %v1055_v28 = vpop.f32.mrb[59].mxu0  ;;  %v1183_v29 = vpop.f32.mrb[59].mxu1  ;;  %v1487_v30 = vmax.f32 %v1423_v20, 0.0  ;;  %v1519_v31 = vmax.f32 %v1455_v21, 0.0 }
 0x1e4   : > { %v1488_v32 = vmax.f32 %v1424_v26, 0.0  ;;  %v1520_v33 = vmax.f32 %v1456_v27, 0.0 }
 0x1e6   : > { %v2277_v34 = vpack.c.bf16 %v1488_v32, %v1487_v30  ;;  %v2357_v35 = vpack.c.bf16 %v1520_v33, %v1519_v31 }
 0x1e7   : > { %v1058_v36 = vpop.f32.mrb[60].mxu0  ;;  %v1186_v37 = vpop.f32.mrb[60].mxu1 }
 0x1e8   : > { %2377 = vst [vmem:[%s3066_s9 + $0x70] sm:$0xff] %v2277_v34   ;;  %2393 = vst [vmem:[%s3066_s9 + $0xf0] sm:$0xff] %v2357_v35   ;;  %v1425_v38 = vadd.f32 %v3059_v17, %v1058_v36  ;;  %v1457_v39 = vadd.f32 %v3059_v17, %v1186_v37  ;;  %v1060_v40 = vpop.f32.mrb[61].mxu0  ;;  %v1188_v41 = vpop.f32.mrb[61].mxu1 }
 0x1e9   : > { %v1061_v42 = vpop.f32.mrb[62].mxu0  ;;  %v1189_v43 = vpop.f32.mrb[62].mxu1 }
 0x1ea   : > { %v1426_v44 = vadd.f32 %v3059_v17, %v1061_v42  ;;  %v1458_v45 = vadd.f32 %v3059_v17, %v1189_v43  ;;  %v1063_v46 = vpop.f32.mrb[63].mxu0  ;;  %v1191_v47 = vpop.f32.mrb[63].mxu1  ;;  %v1489_v48 = vmax.f32 %v1425_v38, 0.0  ;;  %v1521_v49 = vmax.f32 %v1457_v39, 0.0 }
 0x1ec   : > { %v1490_v50 = vmax.f32 %v1426_v44, 0.0  ;;  %v1522_v51 = vmax.f32 %v1458_v45, 0.0 }
 0x1ee   : > { %v2282_v17 = vpack.c.bf16 %v1490_v50, %v1489_v48  ;;  %v2362_v52 = vpack.c.bf16 %v1522_v51, %v1521_v49 }
 0x1f0   : > { %2378 = vst [vmem:[%s3066_s9 + $0x78] sm:$0xff] %v2282_v17   ;;  %2394 = vst [vmem:[%s3066_s9 + $0xf8] sm:$0xff] %v2362_v52  }
 0x1f1   : > { %2690 = shalt.err (!%p2687_p5)
}
 0x1f2   : > { %s2691_s29 = scalar_lea.hbm %s3163_s7, 4096  ;;  %s2695_s20 = scalar_lea.hbm %s3218_s3, 16384 }
 0x1f3   : > { %p2692_p9 = scmp.ne.s32.totalorder %s3163_s7, %s2691_s29  ;;  %p2696_p3 = scmp.lt.u32.totalorder %s3163_s7, %s3218_s3 }
 0x1f4   : > { %p2697_p7 = scmp.lt.u32.totalorder %s2695_s20, %s2691_s29  ;;  %p2699_p4 = scmp.lt.u32.totalorder %s2691_s29, %s3163_s7 }
 0x1f5   : > { %p2693_p1 = pnand %p2692_p9, %p2890_p11 }
 0x1f6   : > { %p2698_p13 = por %p2697_p7, %p2696_p3 }
 0x1f7   : > { %p2694_p2 = pneg %p2693_p1 }
 0x1f8   : > { %p2700_p6 = por %p2699_p4, %p2698_p13 }
 0x1fa   : > { %p2701_p8 = pnand %p2700_p6, %p2694_p2 }
 0x1fc   : > { %2704 = shalt.err (!%p2701_p8)
}
 0x1fd   : > { %s2773_s9 = smov 64   ;;  %s2774_s10 = smov 4  }
 0x1fe   : > { %2433 = dma.vmem_to_hbm [thread:$0]  (%p2890_p11), %s3165_s11, 4096, %s3163_s7, %s1844_s15, %s2773_s9, %s2773_s9, %s2774_s10  }
 0x1ff PF: > { %p2450_p12 = scmp.ge.s32.totalorder %s2763_s17, 2  ;;  %s1873_s18 = sand.u32 1, %s2743_s12  }
 0x200   : > { %p3236_p10 = scmp.ne.s32.totalorder %s3226_s23, 0  ;;  %s1874_s26 = scalar_lea.sflag [#allocation5], %s1873_s18 }
 0x202   : > { %p2444_p0 = pnand %p2450_p12, %p3236_p10 }
 0x204   : > { %2738 = dma.done.wait (!%p2444_p0), %s1874_s26, 4096  }
 0x205   : > { %2740 = vsyncadd (!%p2444_p0), %s1874_s26, 4294963200  ;;  %s20_s17 = sadd.s32 1, %s2763_s17   ;;  %s3237_s12 = smov %s2747_s13 }
 0x206   : > { %p17_p5 = scmp.ge.s32.totalorder %s20_s17, 6   ;;  %s3238_s13 = smov %s2751_s14 }
 0x207   : > { %s3239_s14 = smov %s2899_s5  ;;  %s3240_s15 = smov %s2759_s16 }
 0x208   : > { %s3241_s16 = smov %s3243_s28  ;;  %19 = sbr.rel (!%p17_p5) target bundleno = 7 (0x7), region = 93 }
 0x20f   :  { %1879 = vsyncpa [#allocation4], 1 }
 0x210   :  { %1881 = vsyncpa [#allocation4 + $0x1], 1 }
 0x211   :  { %1882 = vsyncpa [#allocation7], 1 }
 0x212   :  { %1883 = vsyncpa [#allocation5], 1 }
 0x213   :  { %1885 = vsyncpa [#allocation5 + $0x1], 1 }

</bundles_post_ra>
